<compile_context>
chip_gen: v7x
topology: tpu7x:2x2x1
jax: 0.10.0
libtpu: 0.0.40
codegen_flags: <defaults>
</compile_context>

<pallas_src>
import functools

import jax
import jax.numpy as jnp
from jax import lax
from jax.experimental import pallas as pl
from jax.experimental.pallas import tpu as pltpu

_NEG_BIG = -1e30                    # finite "minus infinity"; exp underflows to 0, no NaNs
_RESIDENT_BYTES = 8 * 1024 * 1024   # keep the column operand VMEM-resident below this
_VMEM_LIMIT = 40 * 1024 * 1024      # leaves headroom on v7x's 64 MiB/TC


def _round_up(x, m):
    return (x + m - 1) // m * m


def _cdiv(a, b):
    return (a + b - 1) // b


def _lse_kernel(zr_ref, zc_ref, lse_ref, l_ref, *,
                inv_temp, n_valid, n_pad, blk, col_resident):
    """One (row_block, col_block) tile of the row-wise logsumexp sweep.

    zr_ref : (blk, D)  rows, pre-normalized and pre-scaled by 1/T (matmul dtype)
    zc_ref : (n_pad, D) resident columns  OR  (blk, D) streamed columns
    lse_ref: (blk, 1)  per-row logsumexp output (f32), written on last col step
    l_ref  : (blk, 1)  running sum of exp(sim - 1/T) (f32 scratch)
    """
    i = pl.program_id(0)              # row block     ("parallel")
    j = pl.program_id(1)              # column block  (reduction, last grid axis)
    last_j = pl.num_programs(1) - 1
    has_pad = n_valid < n_pad         # compile-time constant

    @pl.when(j == 0)
    def _init():
        l_ref[...] = jnp.zeros_like(l_ref)

    zr = zr_ref[...]                                        # (blk, D), already * 1/T
    if col_resident and n_pad != blk:
        col0 = pl.multiple_of(j * blk, blk)
        zc = zc_ref[pl.ds(col0, blk), :]                    # slice the resident copy
    else:
        zc = zc_ref[...]

    # MXU matmul contracting the feature dim of BOTH operands (no transpose);
    # bf16 operands, f32 accumulation.  Result is already divided by T.
    sim = lax.dot_general(zr, zc, (((1,), (1,)), ((), ())),
                          preferred_element_type=jnp.float32)   # (blk, blk) f32

    # Fixed-max logsumexp: every (masked) entry is <= 1/T, so exp(sim - 1/T)
    # never overflows and no running max / rescale is needed.
    def _accum(s):
        l_ref[...] += jnp.sum(jnp.exp(s - jnp.float32(inv_temp)),
                              axis=-1, keepdims=True)

    needs_mask = i == j                                     # diagonal tile
    if has_pad:
        needs_mask = needs_mask | (j == last_j)             # padded cols in last block

    @pl.when(needs_mask)
    def _masked():
        row_g = i * blk + lax.broadcasted_iota(jnp.int32, (blk, 1), 0)
        col_g = j * blk + lax.broadcasted_iota(jnp.int32, (1, blk), 1)
        invalid = row_g == col_g
        if has_pad:
            invalid = invalid | (col_g >= n_valid)
        _accum(jnp.where(invalid, jnp.float32(_NEG_BIG), sim))

    @pl.when(jnp.logical_not(needs_mask))
    def _unmasked():
        _accum(sim)

    @pl.when(j == last_j)
    def _finish():
        lse = jnp.float32(inv_temp) + jnp.log(l_ref[...])   # (blk, 1)
        if has_pad:
            row_g = i * blk + lax.broadcasted_iota(jnp.int32, (blk, 1), 0)
            lse = jnp.where(row_g < n_valid, lse, 0.0)      # drop padded rows
        lse_ref[...] = lse


def _pos_kernel(zi_ref, zj_ref, out_ref):
    """Row-tiled accumulator: sum_n <zn_i[n], zn_j[n]> (positives, unscaled)."""
    @pl.when(pl.program_id(0) == 0)
    def _init():
        out_ref[...] = jnp.zeros_like(out_ref)
    out_ref[...] += jnp.sum(zi_ref[...] * zj_ref[...])


def simclr_loss(z_i, z_j, temperature, *, block=256, matmul_dtype=jnp.bfloat16):
    """NT-Xent loss matching the PyTorch SimCLR_Loss forward pass.

    block: row/col tile size for the O(N^2 D) similarity sweep (multiple of 8;
      256 is a good default, 128-256 on v5e).
    matmul_dtype: MXU operand dtype (bf16 default; pass jnp.float32 for exact
      f32 matmuls at lower MXU throughput).
    """
    assert z_i.shape == z_j.shape and z_i.ndim == 2
    assert block % 8 == 0 and block > 0
    b, d = z_i.shape
    n = 2 * b
    inv_temp = 1.0 / float(temperature)
    mm_dtype = jnp.dtype(matmul_dtype)

    # ---- O(N*D) prologue (plain JAX, hoisted out of the tile loop): normalize
    # once, fold 1/T into the row operand, cast to the matmul dtype. -----------
    z = jnp.concatenate([z_i, z_j], axis=0).astype(jnp.float32)
    sumsq = jnp.sum(z * z, axis=-1, keepdims=True)
    zn = z * lax.rsqrt(jnp.maximum(sumsq, 1e-16))   # == torch's max(norm, 1e-8) clamp

    # ---- Tile size: multiple of 8; shrink for small N so >= 2 row blocks exist
    # (keeps both v7x TensorCores busy along the "parallel" row axis). ----------
    blk = min(block, _round_up(n, 8))
    if _cdiv(n, blk) < 2:
        half = _round_up(max(blk // 2, 8), 8)
        if half < blk and _cdiv(n, half) >= 2:
            blk = half
    n_pad = _round_up(n, blk)
    num_blocks = n_pad // blk          # same count for rows and columns

    zn_pad = zn if n_pad == n else jnp.pad(zn, ((0, n_pad - n), (0, 0)))
    zr = (zn_pad * jnp.float32(inv_temp)).astype(mm_dtype)   # rows: normalized * 1/T
    zc = zn_pad.astype(mm_dtype)                             # cols: normalized

    # ---- Column residency: read z from HBM once (instead of num_row_blocks
    # times) whenever the whole column operand fits a modest VMEM budget. ------
    col_resident = (n_pad * d * mm_dtype.itemsize) <= _RESIDENT_BYTES
    if col_resident:
        zc_spec = pl.BlockSpec((n_pad, d), lambda i, j: (0, 0))   # fetched once
    else:
        # TODO(synk): on v6e the streamed path benefits from blk=512 and a
        # deeper pipeline (pl.Buffered(3)) on this spec; kept default here.
        zc_spec = pl.BlockSpec((blk, d), lambda i, j: (j, 0))

    lse_kernel = functools.partial(
        _lse_kernel, inv_temp=inv_temp, n_valid=n, n_pad=n_pad, blk=blk,
        col_resident=col_resident)

    lse = pl.pallas_call(
        lse_kernel,
        out_shape=jax.ShapeDtypeStruct((n_pad, 1), jnp.float32),
        grid_spec=pltpu.PrefetchScalarGridSpec(
            num_scalar_prefetch=0,
            grid=(num_blocks, num_blocks),
            in_specs=[
                pl.BlockSpec((blk, d), lambda i, j: (i, 0)),   # row block
                zc_spec,                                       # columns
            ],
            out_specs=pl.BlockSpec((blk, 1), lambda i, j: (i, 0)),
            scratch_shapes=[pltpu.VMEM((blk, 1), jnp.float32)],   # running sum l
        ),
        compiler_params=pltpu.CompilerParams(
            dimension_semantics=("parallel", "arbitrary"),
            vmem_limit_bytes=_VMEM_LIMIT,
        ),
    )(zr, zc)

    # ---- Positives: O(N*D) row-tiled accumulator (never a full (B,D) block). -
    pos_blk = min(256, _round_up(b, 8))
    b_pad = _round_up(b, pos_blk)
    zi_n, zj_n = zn[:b], zn[b:]
    if b_pad != b:
        zi_n = jnp.pad(zi_n, ((0, b_pad - b), (0, 0)))
        zj_n = jnp.pad(zj_n, ((0, b_pad - b), (0, 0)))
    pos_sum = pl.pallas_call(
        _pos_kernel,
        out_shape=jax.ShapeDtypeStruct((1, 1), jnp.float32),
        grid_spec=pltpu.PrefetchScalarGridSpec(
            num_scalar_prefetch=0,
            grid=(b_pad // pos_blk,),
            in_specs=[pl.BlockSpec((pos_blk, d), lambda i: (i, 0)),
                      pl.BlockSpec((pos_blk, d), lambda i: (i, 0))],
            out_specs=pl.BlockSpec((1, 1), lambda i: (0, 0)),
        ),
        compiler_params=pltpu.CompilerParams(
            dimension_semantics=("arbitrary",),
        ),
    )(zi_n, zj_n)

    pos_total = 2.0 * jnp.float32(inv_temp) * pos_sum[0, 0]
    return (jnp.sum(lse) - pos_total) / jnp.float32(n)


def _simclr_loss_ref(z_i, z_j, temperature):
    # Pure-JAX reference mirroring the PyTorch module.
    z = jnp.concatenate([z_i, z_j], axis=0).astype(jnp.float32)
    n = z.shape[0]
    b = n // 2
    zn = z / jnp.maximum(jnp.linalg.norm(z, axis=-1, keepdims=True), 1e-8)
    sim = (zn @ zn.T) / temperature
    pos = jnp.concatenate([jnp.diag(sim, b), jnp.diag(sim, -b)])
    sim_masked = jnp.where(jnp.eye(n, dtype=bool), -jnp.inf, sim)
    lse = jax.scipy.special.logsumexp(sim_masked, axis=-1)
    return jnp.sum(lse - pos) / n


if __name__ == "__main__":
    key = jax.random.PRNGKey(0)
    temperature = 0.5

    # (batch, hidden, block): single tile, resident-column multi-tile,
    # padded multi-tile, and a case where blk auto-shrinks for 2 row blocks.
    cases = [
        (4, 32, 256),     # N=8  -> one 8x8 tile
        (24, 32, 16),     # N=48 -> 3x3 grid, resident columns sliced in-kernel
        (10, 32, 16),     # N=20 -> padded to 32, exercises pad-mask gating
        (64, 128, 128),   # N=128 -> blk auto-halves to 64 (megacore-friendly)
    ]
    for idx, (batch, hidden, block) in enumerate(cases):
        k1, k2 = jax.random.split(jax.random.fold_in(key, idx))
        z_i = jax.random.normal(k1, (batch, hidden), dtype=jnp.float32)
        z_j = jax.random.normal(k2, (batch, hidden), dtype=jnp.float32)

        ref = jax.block_until_ready(_simclr_loss_ref(z_i, z_j, temperature))

        # Exact-path check (f32 MXU operands).
        loss_f32 = jax.block_until_ready(
            simclr_loss(z_i, z_j, temperature, block=block,
                        matmul_dtype=jnp.float32))
        assert jnp.allclose(loss_f32, ref, rtol=1e-4, atol=1e-4), (
            "f32", (batch, hidden, block), loss_f32, ref)

        # Default fast path (bf16 MXU operands, f32 accumulation / softmax).
        loss_bf16 = jax.block_until_ready(
            simclr_loss(z_i, z_j, temperature, block=block))
        assert jnp.allclose(loss_bf16, ref, rtol=5e-2, atol=5e-2), (
            "bf16", (batch, hidden, block), loss_bf16, ref)

    print("KERNEL_OK")
</pallas_src>

<mosaic_0001>
module attributes {stable_mosaic.version = 11 : i64} {
  func.func @_lse_kernel(%arg0: i32, %arg1: i32, %arg2: memref<8x32xf32, #tpu.memory_space<vmem>>, %arg3: memref<8x32xf32, #tpu.memory_space<vmem>>, %arg4: memref<8x1xf32, #tpu.memory_space<vmem>>, %arg5: memref<8x1xf32, #tpu.memory_space<vmem>>) attributes {dimension_semantics = [#tpu.dimension_semantics<parallel>, #tpu.dimension_semantics<arbitrary>], iteration_bounds = array<i64: 1, 1>, scalar_prefetch = 0 : i64, scratch_operands = 1 : i64, tpu.core_type = #tpu.core_type<tc>, window_params = [{transform_indices = @transform_0, window_bounds = array<i64: 8, 32>}, {pipeline_mode = #tpu.pipeline_mode<synchronous>, transform_indices = @transform_1, window_bounds = array<i64: 8, 32>}, {transform_indices = @transform_2, window_bounds = array<i64: 8, 1>}]} {
    %c0_i32 = arith.constant 0 : i32
    %0 = arith.cmpi eq, %arg1, %c0_i32 : i32
    %1 = arith.extui %0 : i1 to i32
    %c0_i32_0 = arith.constant 0 : i32
    %2 = arith.cmpi ne, %1, %c0_i32_0 : i32
    scf.if %2 {
      %cst_8 = arith.constant 0.000000e+00 : f32
      %15 = vector.broadcast %cst_8 : f32 to vector<8x1xf32>
      %c0_9 = arith.constant 0 : index
      %c0_10 = arith.constant 0 : index
      %16 = vector.load %arg5[%c0_9, %c0_10] : memref<8x1xf32, #tpu.memory_space<vmem>>, vector<8x1xf32>
      tpu.vector_store %arg5[%c0_9, %c0_10], %15 {strides = array<i32>} : memref<8x1xf32, #tpu.memory_space<vmem>>, vector<8x1xf32>,
    } else {
    }
    %c0 = arith.constant 0 : index
    %c0_1 = arith.constant 0 : index
    %3 = vector.load %arg2[%c0, %c0_1] : memref<8x32xf32, #tpu.memory_space<vmem>>, vector<8x32xf32>
    %c0_2 = arith.constant 0 : index
    %c0_3 = arith.constant 0 : index
    %4 = vector.load %arg3[%c0_2, %c0_3] : memref<8x32xf32, #tpu.memory_space<vmem>>, vector<8x32xf32>
    %cst = arith.constant dense<0.000000e+00> : vector<8x8xf32>
    %5 = tpu.matmul %3, %4, %cst {dimension_numbers = #tpu.dot_dimension_numbers<[1], [1], [0], [0], [0, 0, 1, 0], [], []>} : vector<8x32xf32>, vector<8x32xf32>, vector<8x8xf32> -> vector<8x8xf32>
    %6 = arith.cmpi eq, %arg0, %arg1 : i32
    %7 = arith.extui %6 : i1 to i32
    %c0_i32_4 = arith.constant 0 : i32
    %8 = arith.cmpi ne, %7, %c0_i32_4 : i32
    scf.if %8 {
      %c8_i32 = arith.constant 8 : i32
      %15 = arith.muli %arg0, %c8_i32 : i32
      %16 = tpu.iota {dimensions = array<i32: 0>} : vector<8x1xi32>
      %17 = vector.broadcast %15 : i32 to vector<8x1xi32>
      %18 = arith.addi %17, %16 : vector<8x1xi32>
      %c8_i32_8 = arith.constant 8 : i32
      %19 = arith.muli %arg1, %c8_i32_8 : i32
      %20 = tpu.iota {dimensions = array<i32: 1>} : vector<1x8xi32>
      %21 = vector.broadcast %19 : i32 to vector<1x8xi32>
      %22 = arith.addi %21, %20 : vector<1x8xi32>
      %23 = vector.broadcast %18 : vector<8x1xi32> to vector<8x8xi32>
      %24 = vector.broadcast %22 : vector<1x8xi32> to vector<8x8xi32>
      %25 = arith.cmpi eq, %23, %24 : vector<8x8xi32>
      %cst_9 = arith.constant -1.000000e+30 : f32
      %26 = vector.broadcast %cst_9 : f32 to vector<8x8xf32>
      %27 = arith.select %25, %26, %5 : vector<8x8xi1>, vector<8x8xf32>
      %c0_10 = arith.constant 0 : index
      %c0_11 = arith.constant 0 : index
      %28 = vector.load %arg5[%c0_10, %c0_11] : memref<8x1xf32, #tpu.memory_space<vmem>>, vector<8x1xf32>
      %cst_12 = arith.constant 2.000000e+00 : f32
      %29 = vector.broadcast %cst_12 : f32 to vector<8x8xf32>
      %30 = arith.subf %27, %29 : vector<8x8xf32>
      %31 = math.exp %30 : vector<8x8xf32>
      %cst_13 = arith.constant dense<0.000000e+00> : vector<8xf32>
      %32 = vector.multi_reduction <add>, %31, %cst_13 [1] : vector<8x8xf32> to vector<8xf32>
      %33 = vector.shape_cast %32 : vector<8xf32> to vector<8x1xf32>
      %34 = arith.addf %28, %33 : vector<8x1xf32>
      %c0_14 = arith.constant 0 : index
      %c0_15 = arith.constant 0 : index
      %35 = vector.load %arg5[%c0_14, %c0_15] : memref<8x1xf32, #tpu.memory_space<vmem>>, vector<8x1xf32>
      tpu.vector_store %arg5[%c0_14, %c0_15], %34 {strides = array<i32>} : memref<8x1xf32, #tpu.memory_space<vmem>>, vector<8x1xf32>,
    } else {
    }
    %true = arith.constant true
    %9 = arith.xori %6, %true : i1
    %10 = arith.extui %9 : i1 to i32
    %c0_i32_5 = arith.constant 0 : i32
    %11 = arith.cmpi ne, %10, %c0_i32_5 : i32
    scf.if %11 {
      %c0_8 = arith.constant 0 : index
      %c0_9 = arith.constant 0 : index
      %15 = vector.load %arg5[%c0_8, %c0_9] : memref<8x1xf32, #tpu.memory_space<vmem>>, vector<8x1xf32>
      %cst_10 = arith.constant 2.000000e+00 : f32
      %16 = vector.broadcast %cst_10 : f32 to vector<8x8xf32>
      %17 = arith.subf %5, %16 : vector<8x8xf32>
      %18 = math.exp %17 : vector<8x8xf32>
      %cst_11 = arith.constant dense<0.000000e+00> : vector<8xf32>
      %19 = vector.multi_reduction <add>, %18, %cst_11 [1] : vector<8x8xf32> to vector<8xf32>
      %20 = vector.shape_cast %19 : vector<8xf32> to vector<8x1xf32>
      %21 = arith.addf %15, %20 : vector<8x1xf32>
      %c0_12 = arith.constant 0 : index
      %c0_13 = arith.constant 0 : index
      %22 = vector.load %arg5[%c0_12, %c0_13] : memref<8x1xf32, #tpu.memory_space<vmem>>, vector<8x1xf32>
      tpu.vector_store %arg5[%c0_12, %c0_13], %21 {strides = array<i32>} : memref<8x1xf32, #tpu.memory_space<vmem>>, vector<8x1xf32>,
    } else {
    }
    %c0_i32_6 = arith.constant 0 : i32
    %12 = arith.cmpi eq, %arg1, %c0_i32_6 : i32
    %13 = arith.extui %12 : i1 to i32
    %c0_i32_7 = arith.constant 0 : i32
    %14 = arith.cmpi ne, %13, %c0_i32_7 : i32
    scf.if %14 {
      %c0_8 = arith.constant 0 : index
      %c0_9 = arith.constant 0 : index
      %15 = vector.load %arg5[%c0_8, %c0_9] : memref<8x1xf32, #tpu.memory_space<vmem>>, vector<8x1xf32>
      %16 = math.log %15 : vector<8x1xf32>
      %cst_10 = arith.constant 2.000000e+00 : f32
      %17 = vector.broadcast %cst_10 : f32 to vector<8x1xf32>
      %18 = arith.addf %17, %16 : vector<8x1xf32>
      %c0_11 = arith.constant 0 : index
      %c0_12 = arith.constant 0 : index
      %19 = vector.load %arg4[%c0_11, %c0_12] : memref<8x1xf32, #tpu.memory_space<vmem>>, vector<8x1xf32>
      tpu.vector_store %arg4[%c0_11, %c0_12], %18 {strides = array<i32>} : memref<8x1xf32, #tpu.memory_space<vmem>>, vector<8x1xf32>,
    } else {
    }
    return
  }
  func.func @transform_0(%arg0: i32, %arg1: i32) -> (i32, i32) {
    %c0_i32 = arith.constant 0 : i32
    %c0_i32_0 = arith.constant 0 : i32
    return %arg0, %c0_i32 : i32, i32
  }
  func.func @transform_1(%arg0: i32, %arg1: i32) -> (i32, i32) {
    %c0_i32 = arith.constant 0 : i32
    %c0_i32_0 = arith.constant 0 : i32
    %c0_i32_1 = arith.constant 0 : i32
    return %c0_i32, %c0_i32_0 : i32, i32
  }
  func.func @transform_2(%arg0: i32, %arg1: i32) -> (i32, i32) {
    %c0_i32 = arith.constant 0 : i32
    %c0_i32_0 = arith.constant 0 : i32
    return %arg0, %c0_i32 : i32, i32
  }
}

</mosaic_0001>

<bundles_post_ra>
// kernel: tpu_custom_call.1
= control target key start
LH: loop header
LB: loop body
LE: loop exit
PB: predicated region body
PF: predicated region fallthrough
CT: control target
= control target key end

     0   :  { %7 = vsyncpa [#allocation4], 0  ;;  %s293_s0 = inlined_call_operand.hbm [shape: f32[8,32], index: 0, kind: input, shape index: {}]   ;;  %s294_s1 = inlined_call_operand.hbm [shape: f32[8,32], index: 1, kind: input, shape index: {}]   ;;  %s295_s2 = inlined_call_operand.vmem [shape: f32[8,1], index: 2, kind: output, shape index: {}]  }
   0x1   :  { %8 = vsyncpa [#allocation6], 0  ;;  %s244_s9 = smov [#allocation3]   ;;  %s245_s11 = smov [#allocation5]  }
   0x2   :  { %s15_s10 = sshll.u32 %s244_s9, 4  ;;  %s25_s12 = sshll.u32 %s245_s11, 4  ;;  %s16_s10 = int_to_ptr.vmem [resolvable:$true] %s15_s10  ;;  %s26_s12 = int_to_ptr.vmem [resolvable:$true] %s25_s12 }
   0x3   :  { %s196_s15 = scalar_lea.hbm %s293_s0, 128 }
   0x4   :  { %p197_p0 = scmp.ne.s32.totalorder %s293_s0, %s196_s15  ;;  %p200_p1 = scmp.lt.u32.totalorder %s196_s15, %s293_s0 }
   0x6   :  { %p202_p2 = pnand %p200_p1, %p197_p0 }
   0x8   :  { %205 = shalt.err (!%p202_p2)
}
   0x9   :  { %s206_s20 = scalar_lea.vmem %s16_s10, 128  ;;  %p211_p4 = scmp.lt.s32.totalorder %s16_s10, %s16_s10 }
   0xa   :  { %p207_p3 = scmp.ne.s32.totalorder %s16_s10, %s206_s20  ;;  %p212_p5 = scmp.lt.s32.totalorder %s206_s20, %s206_s20 }
   0xc   :  { %p213_p6 = por %p212_p5, %p211_p4 }
   0xe   :  { %p214_p7 = pnand %p213_p6, %p207_p3 }
  0x10   :  { %217 = shalt.err (!%p214_p7)
}
  0x11   :  { %18 = dma.hbm_to_vmem [thread:$0]  %s293_s0, 128, %s16_s10, [#allocation4]  }
  0x12   :  { %s218_s25 = scalar_lea.hbm %s294_s1, 128 }
  0x13   :  { %p219_p8 = scmp.ne.s32.totalorder %s294_s1, %s218_s25  ;;  %p222_p9 = scmp.lt.u32.totalorder %s218_s25, %s294_s1 }
  0x15   :  { %p224_p10 = pnand %p222_p9, %p219_p8 }
  0x17   :  { %227 = shalt.err (!%p224_p10)
}
  0x18   :  { %s228_s30 = scalar_lea.vmem %s26_s12, 128  ;;  %p233_p12 = scmp.lt.s32.totalorder %s26_s12, %s26_s12 }
  0x19   :  { %p229_p11 = scmp.ne.s32.totalorder %s26_s12, %s228_s30  ;;  %p234_p13 = scmp.lt.s32.totalorder %s228_s30, %s228_s30 }
  0x1b   :  { %p235_p0 = por %p234_p13, %p233_p12 }
  0x1d   :  { %p236_p1 = pnand %p235_p0, %p229_p11 }
  0x1f   :  { %239 = shalt.err (!%p236_p1)
}
  0x20   :  { %28 = dma.hbm_to_vmem [thread:$0]  %s294_s1, 128, %s26_s12, [#allocation6]  }
  0x21   :  { %240 = dma.done.wait [#allocation4], 128  }
  0x22   :  { %241 = vsyncadd [#allocation4], 4294967168 }
  0x23   :  { %242 = dma.done.wait [#allocation6], 128  }
  0x24   :  { %243 = vsyncadd [#allocation6], 4294967168  ;;  %vm39_vm0 = vcmask 7168   ;;  %v246_v0 = vmov 0.0   ;;  %vm247_vm1 = vmmov 0   ;;  %vm43_vm2 = vcmask 261120  }
  0x25   :  { %40 = vst.msk [vmem:[#allocation2] sm:$0xff] %vm39_vm0, %v246_v0  ;;  %183 = vmatprep.subr.mxu0 %v246_v0  ;;  %185 = vmatprep.mubr.msk.f32.mxu0 %vm247_vm1, %v246_v0  ;;  %v42_v1 = vld [vmem:[#allocation5] sm:$0xff]  ;;  %v41_v2 = vld [vmem:[#allocation3] sm:$0xff]  ;;  %v125_v3 = vlaneseq  ;;  %vm140_vm4 = vcmask 64512  }
  0x26   :  { %184 = vmatpush3.xpose.msk.msra.mxu0 %vm43_vm2, %v42_v1 }
  0x27   :  { %v126_v4 = vshrl.u32 %v125_v3, 7  ;;  %v131_v5 = vand.u32 127, %v125_v3 }
  0x29   :  { %186 = vmatmul.mubr.msk.f32.vlgmr.msra.gmra.mrb[0].mxu0 %vm43_vm2, %v41_v2  ;;  %vm134_vm3 = vcmp.eq.s32.totalorder %v126_v4, %v131_v5 }
  0x2c   :  { %v136_v13 = vld [vmem:[#allocation2] sm:$0xff] }
  0xfc   :  { %v116_v6 = vpop.f32.mrb[0].mxu0 }
  0xfd   :  { %v135_v7 = vsel %vm134_vm3, -1e+30, %v116_v6  ;;  %v187_v8 = vpop.f32.mrb[1].mxu0 }
  0xfe   :  { %v179_v9 = vadd.f32 -2.0, %v135_v7 }
 0x100   :  { %v138_v10 = vmul.f32 1.442695, %v179_v9 }
 0x102   :  { %192 = vpow2.f32 %v138_v10 }
 0x10c   :  { %v193_v11 = vpop.eup %192 }
 0x10d   :  { %v141_v12 = vsel %vm140_vm4, %v193_v11, 0.0 }
 0x10e   :  { %142 = vadd.xlane.f32.xlu0 %v141_v12 }
 0x19b   :  { %v143_v14 = vpop.xlane.xlu0 %142 }
 0x19c   :  { %v144_v15 = vadd.f32 %v143_v14, %v136_v13 }
 0x19e   :  { %146 = vst.msk [vmem:[#allocation2] sm:$0xff] %vm39_vm0, %v144_v15 }
 0x1a5   :  { %v165_v16 = vld [vmem:[#allocation2] sm:$0xff] }
 0x1a6   :  { %194 = vlog2.f32 %v165_v16 }
 0x1b0   :  { %v195_v17 = vpop.eup %194 }
 0x1b1   :  { %v167_v18 = vmul.f32 0.6931472, %v195_v17 }
 0x1b3   :  { %v168_v19 = vadd.f32 2.0, %v167_v18 }
 0x1b5   :  { %170 = vst.msk [vmem:[%s295_s2] sm:$0xff] %vm39_vm0, %v168_v19 }
 0x1b6   :  { %175 = vsyncpa [#allocation4], 1 }
 0x1b7   :  { %176 = vsyncpa [#allocation6], 1 }

</bundles_post_ra>
